<compile_context>
chip_gen: v6e
topology: v6e:2x2x1
jax: 0.10.0
libtpu: 0.0.40
codegen_flags: <defaults>
</compile_context>

<pallas_src>
import functools

import jax
import jax.numpy as jnp
from jax import lax
from jax.experimental import pallas as pl
from jax.experimental.pallas import tpu as pltpu


def _round_up(x, m):
    return (x + m - 1) // m * m


# ----------------------------------------------------------------------------
# Recurrent kernel: one grid step = one chunk of Tc GRU time steps, all layers
# ----------------------------------------------------------------------------
def gru_chunk_kernel(x_ref, h0_ref, w_ref, b_ref, y_ref, hout_ref,
                     *, n_layers, hp, tc, t_total):
    """
    x_ref:    (Tc, Bp, Hp)     embedded tokens for this time chunk
    h0_ref:   (L, Bp, Hp)      initial hidden state (read at chunk 0 only)
    w_ref:    (L, 2*Hp, 4*Hp)  packed GRU weights; Hp-wide column slabs are
                               [r, z, gi_n, gh_n]; row halves [from x | from h]
    b_ref:    (L, 1, 4*Hp)     packed biases [b_r_sum, b_z_sum, b_in, b_hn]
    y_ref:    (Tc, Bp, Hp)     per-step last-layer hidden (the GRU "output")
    hout_ref: (L, Bp, Hp)      resident output block (constant index_map) used
                               as the carried-state accumulator across chunks
    """
    c = pl.program_id(0)
    bp = x_ref.shape[1]

    @pl.when(c == 0)
    def _():
        # State accumulator lives in the resident hout output block. Invariant:
        # padded lanes/rows of h0 are zero, so padded state stays exactly zero.
        hout_ref[...] = h0_ref[...]

    # Hoisted out of the time loop: bias broadcast once per chunk (JAX does
    # not CSE broadcast_in_dim inside fori_loop bodies).
    b_bc = [jnp.broadcast_to(b_ref[l], (bp, 4 * hp)) for l in range(n_layers)]

    cdt = w_ref.dtype                 # MXU input dtype (f32, or bf16 weights)
    need_mask = (t_total % tc) != 0   # T was padded up to a multiple of Tc

    def step_fn(s, hs):
        x = x_ref[s]                                        # (Bp, Hp) f32
        new_hs = []
        for l in range(n_layers):                           # static, small
            h = hs[l]
            # r/z/n pre-activations: two 128-aligned slab matmuls; no [x|h]
            # staging buffer on the critical path.
            g = (jnp.dot(x.astype(cdt), w_ref[l, 0:hp, :],
                         preferred_element_type=jnp.float32)
                 + jnp.dot(h.astype(cdt), w_ref[l, hp:2 * hp, :],
                           preferred_element_type=jnp.float32)
                 + b_bc[l])
            r = jax.nn.sigmoid(g[:, 0:hp])
            z = jax.nn.sigmoid(g[:, hp:2 * hp])
            n = jnp.tanh(g[:, 2 * hp:3 * hp] + r * g[:, 3 * hp:4 * hp])
            h_new = (1.0 - z) * n + z * h
            if need_mask:
                h_new = jnp.where(c * tc + s < t_total, h_new, h)
            new_hs.append(h_new)
            x = h_new                                       # feed next layer
        y_ref[s] = x                                        # last-layer hidden
        return tuple(new_hs)

    hs0 = tuple(hout_ref[l] for l in range(n_layers))
    hs = lax.fori_loop(0, tc, step_fn, hs0, unroll=(tc <= 8))
    for l in range(n_layers):
        hout_ref[l] = hs[l]


# ----------------------------------------------------------------------------
# Decoder kernel: single big (M, Hp) x (Hp, Op) matmul, tiled over M
# ----------------------------------------------------------------------------
def decoder_kernel(y_ref, dw_ref, db_ref, out_ref):
    out_ref[...] = (jnp.dot(y_ref[...].astype(dw_ref.dtype), dw_ref[...],
                            preferred_element_type=jnp.float32)
                    + db_ref[...])


def _decode(y_flat, dw, db):
    """logits = y_flat @ dw + db, hoisted out of the recurrent kernel."""
    M, Hp = y_flat.shape
    Op = dw.shape[1]
    TM = M if M <= 256 else 256
    Mp = _round_up(M, TM)
    if Mp != M:
        y_flat = jnp.pad(y_flat, ((0, Mp - M), (0, 0)))
    out = pl.pallas_call(
        decoder_kernel,
        grid=(Mp // TM,),
        out_shape=jax.ShapeDtypeStruct((Mp, Op), jnp.float32),
        in_specs=[
            pl.BlockSpec((TM, Hp), lambda m: (m, 0)),
            pl.BlockSpec((Hp, Op), lambda m: (0, 0)),
            pl.BlockSpec((1, Op), lambda m: (0, 0)),
        ],
        out_specs=pl.BlockSpec((TM, Op), lambda m: (m, 0)),
        compiler_params=pltpu.CompilerParams(
            dimension_semantics=("parallel",)),
    )(y_flat, dw, db)
    return out[:M]


# ----------------------------------------------------------------------------
# Parameter packing (layout done once, outside the hot loop)
# ----------------------------------------------------------------------------
def pack_params(params, *, n_layers, hidden_size, output_size,
                param_dtype=jnp.float32):
    # param_dtype=jnp.bfloat16 is recommended on v6e/v7x (f32 accumulation is
    # kept via preferred_element_type); default f32 for exact reference checks.
    H, O = hidden_size, output_size
    Hp = _round_up(H, 128)
    Op = _round_up(O, 128)

    emb = params["embedding"]                                   # (V, H)
    V = emb.shape[0]
    emb_p = jnp.zeros((V, Hp), jnp.float32).at[:, :H].set(emb)

    w_pack = jnp.zeros((n_layers, 2 * Hp, 4 * Hp), jnp.float32)
    b_pack = jnp.zeros((n_layers, 1, 4 * Hp), jnp.float32)
    for l in range(n_layers):
        wi, wh = params["w_ih"][l], params["w_hh"][l]            # (3H, H)
        bi, bh = params["b_ih"][l], params["b_hh"][l]            # (3H,)
        # slab 0: r (x+h), slab 1: z (x+h), slab 2: gi_n (x only),
        # slab 3: gh_n (h only) -- matches PyTorch gate order [r, z, n].
        w_pack = w_pack.at[l, 0:H, 0:H].set(wi[0:H].T)
        w_pack = w_pack.at[l, Hp:Hp + H, 0:H].set(wh[0:H].T)
        w_pack = w_pack.at[l, 0:H, Hp:Hp + H].set(wi[H:2 * H].T)
        w_pack = w_pack.at[l, Hp:Hp + H, Hp:Hp + H].set(wh[H:2 * H].T)
        w_pack = w_pack.at[l, 0:H, 2 * Hp:2 * Hp + H].set(wi[2 * H:3 * H].T)
        w_pack = w_pack.at[l, Hp:Hp + H, 3 * Hp:3 * Hp + H].set(wh[2 * H:3 * H].T)
        b_pack = b_pack.at[l, 0, 0:H].set(bi[0:H] + bh[0:H])
        b_pack = b_pack.at[l, 0, Hp:Hp + H].set(bi[H:2 * H] + bh[H:2 * H])
        b_pack = b_pack.at[l, 0, 2 * Hp:2 * Hp + H].set(bi[2 * H:3 * H])
        b_pack = b_pack.at[l, 0, 3 * Hp:3 * Hp + H].set(bh[2 * H:3 * H])

    dw_pack = jnp.zeros((Hp, Op), jnp.float32).at[:H, :O].set(params["dec_w"].T)
    db_pack = jnp.zeros((1, Op), jnp.float32).at[0, :O].set(params["dec_b"][0])

    return {"emb": emb_p,
            "w": w_pack.astype(param_dtype), "b": b_pack,
            "dw": dw_pack.astype(param_dtype), "db": db_pack,
            "hp": Hp, "op": Op}


# ----------------------------------------------------------------------------
# Wrappers
# ----------------------------------------------------------------------------
def char_rnn_forward_seq(tokens_seq, hidden, packed, *, n_layers, hidden_size,
                         output_size, time_chunk=32):
    """Teacher-forced multi-step forward.

    tokens_seq: (T, B) int32; hidden: (L, B, H).
    Returns (logits (T, B, O), new_hidden (L, B, H)).
    """
    T, B = tokens_seq.shape
    L, _, H = hidden.shape
    Hp, Op = packed["hp"], packed["op"]
    # 8-sublane minimum. NOTE(perf): per-step latency and weight residency are
    # shared across the batch -- fill the MXU M dim with batch at the caller
    # (128 sequences on v5e, 256 on v6e/v7x) for throughput; padding at tiny H
    # already costs ~4x HBM read per step, so batch is the lever, not Hp.
    Bp = _round_up(max(B, 8), 8)

    tc = max(1, min(time_chunk, T))
    Tp = _round_up(T, tc)

    # Embedding lookup for the whole sequence: one XLA gather, lane-padded.
    x_seq = jnp.take(packed["emb"], tokens_seq.reshape(-1), axis=0)
    x_seq = x_seq.reshape(T, B, Hp)
    x_seq = jnp.pad(x_seq, ((0, Tp - T), (0, Bp - B), (0, 0)))

    h0 = jnp.pad(hidden, ((0, 0), (0, Bp - B), (0, Hp - H)))

    kernel = functools.partial(gru_chunk_kernel, n_layers=n_layers, hp=Hp,
                               tc=tc, t_total=T)

    # Only raise the scoped VMEM limit when the resident weights + chunk
    # buffers actually need it (matters on v7x: 64 MiB VMEM, 32 MiB default).
    w_bytes = packed["w"].size * packed["w"].dtype.itemsize
    vmem_est = (w_bytes + packed["b"].size * 4
                + 2 * 2 * tc * Bp * Hp * 4      # x + y chunks, double-buffered
                + 2 * L * Bp * Hp * 4)          # h0 + hout
    vmem_limit = None
    if vmem_est > 28 * 1024 * 1024:
        vmem_limit = min(vmem_est + (4 << 20), 64 << 20)

    yseq, hout = pl.pallas_call(
        kernel,
        grid=(Tp // tc,),
        out_shape=(
            jax.ShapeDtypeStruct((Tp, Bp, Hp), jnp.float32),
            jax.ShapeDtypeStruct((L, Bp, Hp), jnp.float32),
        ),
        in_specs=[
            pl.BlockSpec((tc, Bp, Hp), lambda c: (c, 0, 0)),           # x chunk
            pl.BlockSpec((L, Bp, Hp), lambda c: (0, 0, 0)),            # h0
            pl.BlockSpec((L, 2 * Hp, 4 * Hp), lambda c: (0, 0, 0)),    # GRU W
            pl.BlockSpec((L, 1, 4 * Hp), lambda c: (0, 0, 0)),         # GRU b
        ],
        out_specs=(
            pl.BlockSpec((tc, Bp, Hp), lambda c: (c, 0, 0)),           # y chunk
            pl.BlockSpec((L, Bp, Hp), lambda c: (0, 0, 0)),            # h state
        ),
        compiler_params=pltpu.CompilerParams(
            dimension_semantics=("arbitrary",),
            vmem_limit_bytes=vmem_limit),
    )(x_seq, h0, packed["w"], packed["b"])

    # Decoder hoisted out of the recurrence: one (T*Bp, Hp) x (Hp, Op) matmul.
    y_flat = yseq[:T].reshape(T * Bp, Hp)
    logits = _decode(y_flat, packed["dw"], packed["db"]).reshape(T, Bp, Op)
    return logits[:, :B, :output_size], hout[:, :B, :H]


def char_rnn_forward(tokens, hidden, packed, *, n_layers, hidden_size,
                     output_size):
    """Mirrors CharRNN.forward(input, hidden): a single time-step batch."""
    logits, hout = char_rnn_forward_seq(
        tokens[None, :], hidden, packed, n_layers=n_layers,
        hidden_size=hidden_size, output_size=output_size, time_chunk=1)
    return logits[0], hout


# ----------------------------------------------------------------------------
# Params / reference
# ----------------------------------------------------------------------------
def init_params(key, input_size, hidden_size, output_size, n_layers):
    """Deterministic synthetic init (shapes match nn.Embedding/nn.GRU/nn.Linear)."""
    ks = jax.random.split(key, 7)
    scale = 0.1
    return {
        "embedding": scale * jax.random.normal(
            ks[0], (input_size, hidden_size), jnp.float32),
        "w_ih": scale * jax.random.normal(
            ks[1], (n_layers, 3 * hidden_size, hidden_size), jnp.float32),
        "w_hh": scale * jax.random.normal(
            ks[2], (n_layers, 3 * hidden_size, hidden_size), jnp.float32),
        "b_ih": scale * jax.random.normal(
            ks[3], (n_layers, 3 * hidden_size), jnp.float32),
        "b_hh": scale * jax.random.normal(
            ks[4], (n_layers, 3 * hidden_size), jnp.float32),
        "dec_w": scale * jax.random.normal(
            ks[5], (output_size, hidden_size), jnp.float32),
        "dec_b": scale * jax.random.normal(
            ks[6], (1, output_size), jnp.float32),
    }


def reference_forward(tokens, hidden, params, *, n_layers, hidden_size):
    """Pure-JAX reference implementing PyTorch GRU cell semantics (one step)."""
    H = hidden_size
    x = jnp.take(params["embedding"], tokens, axis=0)
    new_h = []
    for l in range(n_layers):
        h = hidden[l]
        gi = x @ params["w_ih"][l].T + params["b_ih"][l]
        gh = h @ params["w_hh"][l].T + params["b_hh"][l]
        r = jax.nn.sigmoid(gi[:, :H] + gh[:, :H])
        z = jax.nn.sigmoid(gi[:, H:2 * H] + gh[:, H:2 * H])
        n = jnp.tanh(gi[:, 2 * H:] + r * gh[:, 2 * H:])
        h = (1.0 - z) * n + z * h
        new_h.append(h)
        x = h
    logits = x @ params["dec_w"].T + params["dec_b"]
    return logits, jnp.stack(new_h, axis=0)


if __name__ == "__main__":
    input_size = 64     # vocab size
    hidden_size = 32
    output_size = 64
    n_layers = 2
    batch = 2
    seq_len = 8

    key = jax.random.PRNGKey(0)
    k_par, k_tok, k_seq = jax.random.split(key, 3)

    params = init_params(k_par, input_size, hidden_size, output_size, n_layers)
    packed = pack_params(params, n_layers=n_layers, hidden_size=hidden_size,
                         output_size=output_size)

    # --- single-step forward (matches CharRNN.forward semantics) -------------
    tokens = jax.random.randint(k_tok, (batch,), 0, input_size, jnp.int32)
    hidden0 = jnp.zeros((n_layers, batch, hidden_size), jnp.float32)

    logits, hidden1 = char_rnn_forward(
        tokens, hidden0, packed, n_layers=n_layers,
        hidden_size=hidden_size, output_size=output_size)
    jax.block_until_ready((logits, hidden1))

    ref_logits, ref_hidden = reference_forward(
        tokens, hidden0, params, n_layers=n_layers, hidden_size=hidden_size)
    assert jnp.allclose(logits, ref_logits, atol=1e-4, rtol=1e-4)
    assert jnp.allclose(hidden1, ref_hidden, atol=1e-4, rtol=1e-4)

    # --- fused multi-step (teacher-forced) forward ---------------------------
    tokens_seq = jax.random.randint(
        k_seq, (seq_len, batch), 0, input_size, jnp.int32)
    seq_logits, seq_hidden = char_rnn_forward_seq(
        tokens_seq, hidden0, packed, n_layers=n_layers,
        hidden_size=hidden_size, output_size=output_size)
    jax.block_until_ready((seq_logits, seq_hidden))

    h_ref = hidden0
    for t in range(seq_len):
        lg_ref, h_ref = reference_forward(
            tokens_seq[t], h_ref, params,
            n_layers=n_layers, hidden_size=hidden_size)
        assert jnp.allclose(seq_logits[t], lg_ref, atol=1e-4, rtol=1e-4)
    assert jnp.allclose(seq_hidden, h_ref, atol=1e-4, rtol=1e-4)

    print("KERNEL_OK")
</pallas_src>

<mosaic_0001>
module attributes {stable_mosaic.version = 11 : i64} {
  func.func @gru_chunk_kernel(%arg0: i32, %arg1: memref<1x8x128xf32, #tpu.memory_space<vmem>>, %arg2: memref<2x8x128xf32, #tpu.memory_space<vmem>>, %arg3: memref<2x256x512xf32, #tpu.memory_space<vmem>>, %arg4: memref<2x1x512xf32, #tpu.memory_space<vmem>>, %arg5: memref<1x8x128xf32, #tpu.memory_space<vmem>>, %arg6: memref<2x8x128xf32, #tpu.memory_space<vmem>>) attributes {dimension_semantics = [#tpu.dimension_semantics<arbitrary>], iteration_bounds = array<i64: 1>, scalar_prefetch = 0 : i64, scratch_operands = 0 : i64, tpu.core_type = #tpu.core_type<tc>, window_params = [{transform_indices = @transform_0, window_bounds = array<i64: 1, 8, 128>}, {pipeline_mode = #tpu.pipeline_mode<synchronous>, transform_indices = @transform_1, window_bounds = array<i64: 2, 8, 128>}, {pipeline_mode = #tpu.pipeline_mode<synchronous>, transform_indices = @transform_2, window_bounds = array<i64: 2, 256, 512>}, {pipeline_mode = #tpu.pipeline_mode<synchronous>, transform_indices = @transform_3, window_bounds = array<i64: 2, 1, 512>}, {transform_indices = @transform_4, window_bounds = array<i64: 1, 8, 128>}, {pipeline_mode = #tpu.pipeline_mode<synchronous>, transform_indices = @transform_5, window_bounds = array<i64: 2, 8, 128>}]} {
    %c0_i32 = arith.constant 0 : i32
    %0 = arith.cmpi eq, %arg0, %c0_i32 : i32
    %1 = arith.extui %0 : i1 to i32
    %c0_i32_0 = arith.constant 0 : i32
    %2 = arith.cmpi ne, %1, %c0_i32_0 : i32
    scf.if %2 {
      %c0_42 = arith.constant 0 : index
      %c0_43 = arith.constant 0 : index
      %c0_44 = arith.constant 0 : index
      %88 = vector.load %arg2[%c0_42, %c0_43, %c0_44] : memref<2x8x128xf32, #tpu.memory_space<vmem>>, vector<2x8x128xf32>
      %c0_45 = arith.constant 0 : index
      %c0_46 = arith.constant 0 : index
      %c0_47 = arith.constant 0 : index
      %89 = vector.load %arg6[%c0_45, %c0_46, %c0_47] : memref<2x8x128xf32, #tpu.memory_space<vmem>>, vector<2x8x128xf32>
      tpu.vector_store %arg6[%c0_45, %c0_46, %c0_47], %88 {strides = array<i32>} : memref<2x8x128xf32, #tpu.memory_space<vmem>>, vector<2x8x128xf32>,
    } else {
    }
    %c0 = arith.constant 0 : index
    %c0_1 = arith.constant 0 : index
    %c0_2 = arith.constant 0 : index
    %3 = vector.load %arg4[%c0, %c0_1, %c0_2] : memref<2x1x512xf32, #tpu.memory_space<vmem>>, vector<1x1x512xf32>
    %4 = vector.shape_cast %3 : vector<1x1x512xf32> to vector<1x512xf32>
    %5 = vector.shape_cast %4 : vector<1x512xf32> to vector<1x512xf32>
    %6 = vector.broadcast %5 : vector<1x512xf32> to vector<8x512xf32>
    %c1 = arith.constant 1 : index
    %c0_3 = arith.constant 0 : index
    %c0_4 = arith.constant 0 : index
    %7 = vector.load %arg4[%c1, %c0_3, %c0_4] : memref<2x1x512xf32, #tpu.memory_space<vmem>>, vector<1x1x512xf32>
    %8 = vector.shape_cast %7 : vector<1x1x512xf32> to vector<1x512xf32>
    %9 = vector.shape_cast %8 : vector<1x512xf32> to vector<1x512xf32>
    %10 = vector.broadcast %9 : vector<1x512xf32> to vector<8x512xf32>
    %c0_5 = arith.constant 0 : index
    %c0_6 = arith.constant 0 : index
    %c0_7 = arith.constant 0 : index
    %11 = vector.load %arg6[%c0_5, %c0_6, %c0_7] : memref<2x8x128xf32, #tpu.memory_space<vmem>>, vector<1x8x128xf32>
    %12 = vector.shape_cast %11 : vector<1x8x128xf32> to vector<8x128xf32>
    %c1_8 = arith.constant 1 : index
    %c0_9 = arith.constant 0 : index
    %c0_10 = arith.constant 0 : index
    %13 = vector.load %arg6[%c1_8, %c0_9, %c0_10] : memref<2x8x128xf32, #tpu.memory_space<vmem>>, vector<1x8x128xf32>
    %14 = vector.shape_cast %13 : vector<1x8x128xf32> to vector<8x128xf32>
    %c0_i32_11 = arith.constant 0 : i32
    %15 = arith.index_cast %c0_i32_11 : i32 to index
    %c0_12 = arith.constant 0 : index
    %c0_13 = arith.constant 0 : index
    %16 = vector.load %arg1[%15, %c0_12, %c0_13] : memref<1x8x128xf32, #tpu.memory_space<vmem>>, vector<1x8x128xf32>
    %17 = vector.shape_cast %16 : vector<1x8x128xf32> to vector<8x128xf32>
    %c0_14 = arith.constant 0 : index
    %c0_15 = arith.constant 0 : index
    %c0_16 = arith.constant 0 : index
    %18 = vector.load %arg3[%c0_14, %c0_15, %c0_16] : memref<2x256x512xf32, #tpu.memory_space<vmem>>, vector<1x128x512xf32>
    %19 = vector.shape_cast %18 : vector<1x128x512xf32> to vector<128x512xf32>
    %cst = arith.constant dense<0.000000e+00> : vector<8x512xf32>
    %20 = tpu.matmul %17, %19, %cst {dimension_numbers = #tpu.dot_dimension_numbers<[1], [0], [0], [1], [0, 0, 1, 1], [], []>} : vector<8x128xf32>, vector<128x512xf32>, vector<8x512xf32> -> vector<8x512xf32>
    %c0_17 = arith.constant 0 : index
    %c128 = arith.constant 128 : index
    %c0_18 = arith.constant 0 : index
    %21 = vector.load %arg3[%c0_17, %c128, %c0_18] : memref<2x256x512xf32, #tpu.memory_space<vmem>>, vector<1x128x512xf32>
    %22 = vector.shape_cast %21 : vector<1x128x512xf32> to vector<128x512xf32>
    %cst_19 = arith.constant dense<0.000000e+00> : vector<8x512xf32>
    %23 = tpu.matmul %12, %22, %cst_19 {dimension_numbers = #tpu.dot_dimension_numbers<[1], [0], [0], [1], [0, 0, 1, 1], [], []>} : vector<8x128xf32>, vector<128x512xf32>, vector<8x512xf32> -> vector<8x512xf32>
    %24 = arith.addf %20, %23 : vector<8x512xf32>
    %25 = arith.addf %24, %6 : vector<8x512xf32>
    %26 = vector.extract_strided_slice %25 {offsets = [0, 0], sizes = [8, 128], strides = [1, 1]} : vector<8x512xf32> to vector<8x128xf32>
    %27 = arith.negf %26 : vector<8x128xf32>
    %28 = math.exp %27 : vector<8x128xf32>
    %cst_20 = arith.constant 1.000000e+00 : f32
    %29 = vector.broadcast %cst_20 : f32 to vector<8x128xf32>
    %30 = arith.addf %29, %28 : vector<8x128xf32>
    %31 = arith.divf %29, %30 : vector<8x128xf32>
    %32 = vector.extract_strided_slice %25 {offsets = [0, 128], sizes = [8, 128], strides = [1, 1]} : vector<8x512xf32> to vector<8x128xf32>
    %33 = arith.negf %32 : vector<8x128xf32>
    %34 = math.exp %33 : vector<8x128xf32>
    %cst_21 = arith.constant 1.000000e+00 : f32
    %35 = vector.broadcast %cst_21 : f32 to vector<8x128xf32>
    %36 = arith.addf %35, %34 : vector<8x128xf32>
    %37 = arith.divf %35, %36 : vector<8x128xf32>
    %38 = vector.extract_strided_slice %25 {offsets = [0, 256], sizes = [8, 128], strides = [1, 1]} : vector<8x512xf32> to vector<8x128xf32>
    %39 = vector.extract_strided_slice %25 {offsets = [0, 384], sizes = [8, 128], strides = [1, 1]} : vector<8x512xf32> to vector<8x128xf32>
    %40 = arith.mulf %31, %39 : vector<8x128xf32>
    %41 = arith.addf %38, %40 : vector<8x128xf32>
    %42 = math.tanh %41 : vector<8x128xf32>
    %cst_22 = arith.constant 1.000000e+00 : f32
    %43 = vector.broadcast %cst_22 : f32 to vector<8x128xf32>
    %44 = arith.subf %43, %37 : vector<8x128xf32>
    %45 = arith.mulf %44, %42 : vector<8x128xf32>
    %46 = arith.mulf %37, %12 : vector<8x128xf32>
    %47 = arith.addf %45, %46 : vector<8x128xf32>
    %c1_23 = arith.constant 1 : index
    %c0_24 = arith.constant 0 : index
    %c0_25 = arith.constant 0 : index
    %48 = vector.load %arg3[%c1_23, %c0_24, %c0_25] : memref<2x256x512xf32, #tpu.memory_space<vmem>>, vector<1x128x512xf32>
    %49 = vector.shape_cast %48 : vector<1x128x512xf32> to vector<128x512xf32>
    %cst_26 = arith.constant dense<0.000000e+00> : vector<8x512xf32>
    %50 = tpu.matmul %47, %49, %cst_26 {dimension_numbers = #tpu.dot_dimension_numbers<[1], [0], [0], [1], [0, 0, 1, 1], [], []>} : vector<8x128xf32>, vector<128x512xf32>, vector<8x512xf32> -> vector<8x512xf32>
    %c1_27 = arith.constant 1 : index
    %c128_28 = arith.constant 128 : index
    %c0_29 = arith.constant 0 : index
    %51 = vector.load %arg3[%c1_27, %c128_28, %c0_29] : memref<2x256x512xf32, #tpu.memory_space<vmem>>, vector<1x128x512xf32>
    %52 = vector.shape_cast %51 : vector<1x128x512xf32> to vector<128x512xf32>
    %cst_30 = arith.constant dense<0.000000e+00> : vector<8x512xf32>
    %53 = tpu.matmul %14, %52, %cst_30 {dimension_numbers = #tpu.dot_dimension_numbers<[1], [0], [0], [1], [0, 0, 1, 1], [], []>} : vector<8x128xf32>, vector<128x512xf32>, vector<8x512xf32> -> vector<8x512xf32>
    %54 = arith.addf %50, %53 : vector<8x512xf32>
    %55 = arith.addf %54, %10 : vector<8x512xf32>
    %56 = vector.extract_strided_slice %55 {offsets = [0, 0], sizes = [8, 128], strides = [1, 1]} : vector<8x512xf32> to vector<8x128xf32>
    %57 = arith.negf %56 : vector<8x128xf32>
    %58 = math.exp %57 : vector<8x128xf32>
    %cst_31 = arith.constant 1.000000e+00 : f32
    %59 = vector.broadcast %cst_31 : f32 to vector<8x128xf32>
    %60 = arith.addf %59, %58 : vector<8x128xf32>
    %61 = arith.divf %59, %60 : vector<8x128xf32>
    %62 = vector.extract_strided_slice %55 {offsets = [0, 128], sizes = [8, 128], strides = [1, 1]} : vector<8x512xf32> to vector<8x128xf32>
    %63 = arith.negf %62 : vector<8x128xf32>
    %64 = math.exp %63 : vector<8x128xf32>
    %cst_32 = arith.constant 1.000000e+00 : f32
    %65 = vector.broadcast %cst_32 : f32 to vector<8x128xf32>
    %66 = arith.addf %65, %64 : vector<8x128xf32>
    %67 = arith.divf %65, %66 : vector<8x128xf32>
    %68 = vector.extract_strided_slice %55 {offsets = [0, 256], sizes = [8, 128], strides = [1, 1]} : vector<8x512xf32> to vector<8x128xf32>
    %69 = vector.extract_strided_slice %55 {offsets = [0, 384], sizes = [8, 128], strides = [1, 1]} : vector<8x512xf32> to vector<8x128xf32>
    %70 = arith.mulf %61, %69 : vector<8x128xf32>
    %71 = arith.addf %68, %70 : vector<8x128xf32>
    %72 = math.tanh %71 : vector<8x128xf32>
    %cst_33 = arith.constant 1.000000e+00 : f32
    %73 = vector.broadcast %cst_33 : f32 to vector<8x128xf32>
    %74 = arith.subf %73, %67 : vector<8x128xf32>
    %75 = arith.mulf %74, %72 : vector<8x128xf32>
    %76 = arith.mulf %67, %14 : vector<8x128xf32>
    %77 = arith.addf %75, %76 : vector<8x128xf32>
    %78 = arith.index_cast %c0_i32_11 : i32 to index
    %c0_34 = arith.constant 0 : index
    %c0_35 = arith.constant 0 : index
    %79 = vector.load %arg5[%78, %c0_34, %c0_35] : memref<1x8x128xf32, #tpu.memory_space<vmem>>, vector<1x8x128xf32>
    %80 = vector.shape_cast %79 : vector<1x8x128xf32> to vector<8x128xf32>
    %81 = vector.shape_cast %77 : vector<8x128xf32> to vector<1x8x128xf32>
    tpu.vector_store %arg5[%78, %c0_34, %c0_35], %81 {strides = array<i32>} : memref<1x8x128xf32, #tpu.memory_space<vmem>>, vector<1x8x128xf32>,
    %c1_i32 = arith.constant 1 : i32
    %c0_36 = arith.constant 0 : index
    %c0_37 = arith.constant 0 : index
    %c0_38 = arith.constant 0 : index
    %82 = vector.load %arg6[%c0_36, %c0_37, %c0_38] : memref<2x8x128xf32, #tpu.memory_space<vmem>>, vector<1x8x128xf32>
    %83 = vector.shape_cast %82 : vector<1x8x128xf32> to vector<8x128xf32>
    %84 = vector.shape_cast %47 : vector<8x128xf32> to vector<1x8x128xf32>
    tpu.vector_store %arg6[%c0_36, %c0_37, %c0_38], %84 {strides = array<i32>} : memref<2x8x128xf32, #tpu.memory_space<vmem>>, vector<1x8x128xf32>,
    %c1_39 = arith.constant 1 : index
    %c0_40 = arith.constant 0 : index
    %c0_41 = arith.constant 0 : index
    %85 = vector.load %arg6[%c1_39, %c0_40, %c0_41] : memref<2x8x128xf32, #tpu.memory_space<vmem>>, vector<1x8x128xf32>
    %86 = vector.shape_cast %85 : vector<1x8x128xf32> to vector<8x128xf32>
    %87 = vector.shape_cast %77 : vector<8x128xf32> to vector<1x8x128xf32>
    tpu.vector_store %arg6[%c1_39, %c0_40, %c0_41], %87 {strides = array<i32>} : memref<2x8x128xf32, #tpu.memory_space<vmem>>, vector<1x8x128xf32>,
    return
  }
  func.func @transform_0(%arg0: i32) -> (i32, i32, i32) {
    %c0_i32 = arith.constant 0 : i32
    %c0_i32_0 = arith.constant 0 : i32
    %c0_i32_1 = arith.constant 0 : i32
    return %arg0, %c0_i32, %c0_i32_0 : i32, i32, i32
  }
  func.func @transform_1(%arg0: i32) -> (i32, i32, i32) {
    %c0_i32 = arith.constant 0 : i32
    %c0_i32_0 = arith.constant 0 : i32
    %c0_i32_1 = arith.constant 0 : i32
    %c0_i32_2 = arith.constant 0 : i32
    return %c0_i32, %c0_i32_0, %c0_i32_1 : i32, i32, i32
  }
  func.func @transform_2(%arg0: i32) -> (i32, i32, i32) {
    %c0_i32 = arith.constant 0 : i32
    %c0_i32_0 = arith.constant 0 : i32
    %c0_i32_1 = arith.constant 0 : i32
    %c0_i32_2 = arith.constant 0 : i32
    return %c0_i32, %c0_i32_0, %c0_i32_1 : i32, i32, i32
  }
  func.func @transform_3(%arg0: i32) -> (i32, i32, i32) {
    %c0_i32 = arith.constant 0 : i32
    %c0_i32_0 = arith.constant 0 : i32
    %c0_i32_1 = arith.constant 0 : i32
    %c0_i32_2 = arith.constant 0 : i32
    return %c0_i32, %c0_i32_0, %c0_i32_1 : i32, i32, i32
  }
  func.func @transform_4(%arg0: i32) -> (i32, i32, i32) {
    %c0_i32 = arith.constant 0 : i32
    %c0_i32_0 = arith.constant 0 : i32
    %c0_i32_1 = arith.constant 0 : i32
    return %arg0, %c0_i32, %c0_i32_0 : i32, i32, i32
  }
  func.func @transform_5(%arg0: i32) -> (i32, i32, i32) {
    %c0_i32 = arith.constant 0 : i32
    %c0_i32_0 = arith.constant 0 : i32
    %c0_i32_1 = arith.constant 0 : i32
    %c0_i32_2 = arith.constant 0 : i32
    return %c0_i32, %c0_i32_0, %c0_i32_1 : i32, i32, i32
  }
}

</mosaic_0001>

<bundles_post_ra>
// kernel: tpu_custom_call.1
= control target key start
LH: loop header
LB: loop body
LE: loop exit
PB: predicated region body
PF: predicated region fallthrough
CT: control target
= control target key end

     0   :  { %11 = vsyncpa [#allocation3], 0  ;;  %s1296_s0 = inlined_call_operand.hbm [shape: f32[1,8,128], index: 0, kind: input, shape index: {}]   ;;  %s1297_s1 = inlined_call_operand.hbm [shape: f32[2,8,128], index: 1, kind: input, shape index: {}]   ;;  %s1298_s2 = inlined_call_operand.hbm [shape: f32[2,256,512], index: 2, kind: input, shape index: {}]   ;;  %s1299_s3 = inlined_call_operand.hbm [shape: f32[2,1,512], index: 3, kind: input, shape index: {}]   ;;  %s1300_s4 = inlined_call_operand.hbm [shape: f32[1,8,128], index: 4, kind: output, shape index: {0}]   ;;  %s1301_s5 = inlined_call_operand.hbm [shape: f32[2,8,128], index: 5, kind: output, shape index: {1}]  }
   0x1   :  { %12 = vsyncpa [#allocation6], 0 }
   0x2   :  { %13 = vsyncpa [#allocation9], 0 }
   0x3   :  { %14 = vsyncpa [#allocation4], 0 }
   0x4   :  { %15 = vsyncpa [#allocation12], 0  ;;  %s1205_s18 = smov [#allocation5]  }
   0x5   :  { %s31_s19 = sshll.u32 %s1205_s18, 4  ;;  %s32_s19 = int_to_ptr.vmem [resolvable:$true] %s31_s19 }
   0x6   :  { %s1083_s20 = scalar_lea.vmem %s32_s19, 256  ;;  %p1088_p1 = scmp.lt.s32.totalorder %s32_s19, %s32_s19 }
   0x7   :  { %p1084_p0 = scmp.ne.s32.totalorder %s32_s19, %s1083_s20  ;;  %p1089_p2 = scmp.lt.s32.totalorder %s1083_s20, %s1083_s20 }
   0x9   :  { %p1090_p3 = por %p1089_p2, %p1088_p1 }
   0xb   :  { %p1091_p4 = pnand %p1090_p3, %p1084_p0 }
   0xd   :  { %1094 = shalt.err (!%p1091_p4)
}
   0xe   :  { %s1206_s21 = smov 128   ;;  %s1207_s22 = smov 8  }
   0xf   :  { %37 = dma.hbm_to_vmem [thread:$0]  %s1297_s1, 256, %s32_s19, [#allocation6], %s1206_s21, %s1206_s21, %s1207_s22  }
  0x10   :  { %s1208_s25 = smov [#allocation2]   ;;  %s1209_s27 = smov [#allocation7]  }
  0x11   :  { %s22_s26 = sshll.u32 %s1208_s25, 4  ;;  %s43_s28 = sshll.u32 %s1209_s27, 4  ;;  %s23_s26 = int_to_ptr.vmem [resolvable:$true] %s22_s26  ;;  %s44_s28 = int_to_ptr.vmem [resolvable:$true] %s43_s28 }
  0x12   :  { %s1103_s29 = scalar_lea.vmem %s23_s26, 128  ;;  %p1108_p6 = scmp.lt.s32.totalorder %s23_s26, %s23_s26 }
  0x13   :  { %p1104_p5 = scmp.ne.s32.totalorder %s23_s26, %s1103_s29  ;;  %p1109_p7 = scmp.lt.s32.totalorder %s1103_s29, %s1103_s29 }
  0x15   :  { %p1110_p8 = por %p1109_p7, %p1108_p6 }
  0x17   :  { %p1111_p9 = pnand %p1110_p8, %p1104_p5 }
  0x19   :  { %1114 = shalt.err (!%p1111_p9)
}
  0x1a   :  { %25 = dma.hbm_to_vmem [thread:$0]  %s1296_s0, 128, %s23_s26, [#allocation3]  }
  0x1b   :  { %s1123_s7 = scalar_lea.vmem %s44_s28, 32768  ;;  %p1128_p11 = scmp.lt.s32.totalorder %s44_s28, %s44_s28 }
  0x1c   :  { %p1124_p10 = scmp.ne.s32.totalorder %s44_s28, %s1123_s7  ;;  %p1129_p12 = scmp.lt.s32.totalorder %s1123_s7, %s1123_s7 }
  0x1e   :  { %p1130_p13 = por %p1129_p12, %p1128_p11 }
  0x20   :  { %p1131_p0 = pnand %p1130_p13, %p1124_p10 }
  0x22   :  { %1134 = shalt.err (!%p1131_p0)
}
  0x23   :  { %s1210_s1 = smov 512   ;;  %s1211_s8 = smov 32  }
  0x24   :  { %49 = dma.hbm_to_vmem [thread:$0]  %s1298_s2, 32768, %s44_s28, [#allocation6], %s1210_s1, %s1210_s1, %s1211_s8  }
  0x25   :  { %s1212_s11 = smov [#allocation8]  }
  0x26   :  { %s55_s12 = sshll.u32 %s1212_s11, 4  ;;  %s56_s12 = int_to_ptr.vmem [resolvable:$true] %s55_s12 }
  0x27   :  { %s1143_s13 = scalar_lea.vmem %s56_s12, 128  ;;  %p1148_p2 = scmp.lt.s32.totalorder %s56_s12, %s56_s12 }
  0x28   :  { %p1144_p1 = scmp.ne.s32.totalorder %s56_s12, %s1143_s13  ;;  %p1149_p3 = scmp.lt.s32.totalorder %s1143_s13, %s1143_s13 }
  0x2a   :  { %p1150_p4 = por %p1149_p3, %p1148_p2 }
  0x2c   :  { %p1151_p5 = pnand %p1150_p4, %p1144_p1 }
  0x2e   :  { %1154 = shalt.err (!%p1151_p5)
}
  0x2f   :  { %s1213_s0 = smov 64   ;;  %s1214_s14 = smov 4  }
  0x30   :  { %61 = dma.hbm_to_vmem [thread:$0]  %s1299_s3, 128, %s56_s12, [#allocation9], %s1213_s0, %s1213_s0, %s1214_s14  }
  0x31   :  { %1195 = dma.done.wait [#allocation3], 128  }
  0x32   :  { %1196 = vsyncadd [#allocation3], 4294967168 }
  0x33   :  { %1197 = dma.done.wait [#allocation6], 33024  }
  0x34   :  { %1198 = vsyncadd [#allocation6], 4294934272 }
  0x35   :  { %1199 = dma.done.wait [#allocation9], 128  }
  0x36   :  { %1200 = vsyncadd [#allocation9], 4294967168  ;;  %v1215_v0 = vmov 0.0   ;;  %v256_v1 = vld [vmem:[#allocation7 + $0x3e8] sm:$0xff]  ;;  %v258_v2 = vld [vmem:[#allocation7 + $0x3f8] sm:$0xff]  ;;  %s1216_s2 = smov [#allocation10]  }
  0x37   :  { %323 = vmatprep.mubr.f32.mxu0 %v1215_v0  ;;  %394 = vmatprep.mubr.f32.mxu1 %v1215_v0  ;;  %v255_v3 = vld [vmem:[#allocation7 + $0x3e0] sm:$0xff]  ;;  %v257_v4 = vld [vmem:[#allocation7 + $0x3f0] sm:$0xff]  ;;  %v252_v5 = vld [vmem:[#allocation7 + $0x3c8] sm:$0xff]  ;;  %s1011_s3 = sshll.u32 %s1216_s2, 4  ;;  %s1217_s17 = smov [#allocation11]   ;;  %s1012_s3 = int_to_ptr.vmem [resolvable:$true] %s1011_s3 }
  0x38   :  { %259 = vmatprep.subr.mxu0 %v256_v1  ;;  %330 = vmatprep.subr.mxu1 %v258_v2  ;;  %v254_v6 = vld [vmem:[#allocation7 + $0x3d8] sm:$0xff]  ;;  %v251_v7 = vld [vmem:[#allocation7 + $0x3c0] sm:$0xff]  ;;  %v253_v8 = vld [vmem:[#allocation7 + $0x3d0] sm:$0xff]  ;;  %s1020_s18 = sshll.u32 %s1217_s17, 4  ;;  %s1155_s19 = scalar_lea.vmem %s1012_s3, 128  ;;  %s1021_s18 = int_to_ptr.vmem [resolvable:$true] %s1020_s18 }
  0x39   :  { %260 = vmatpush1.msra.mxu0 %v255_v3  ;;  %331 = vmatpush1.msra.mxu1 %v257_v4  ;;  %v248_v9 = vld [vmem:[#allocation7 + $0x3a8] sm:$0xff]  ;;  %v250_v10 = vld [vmem:[#allocation7 + $0x3b8] sm:$0xff]  ;;  %v247_v11 = vld [vmem:[#allocation7 + $0x3a0] sm:$0xff]  ;;  %p1156_p6 = scmp.ne.s32.totalorder %s1012_s3, %s1155_s19  ;;  %p1160_p7 = scmp.lt.s32.totalorder %s1012_s3, %s1012_s3 }
  0x3a   :  { %261 = vmatprep.subr.mxu0 %v252_v5  ;;  %332 = vmatprep.subr.mxu1 %v254_v6  ;;  %v249_v12 = vld [vmem:[#allocation7 + $0x3b0] sm:$0xff]  ;;  %v244_v13 = vld [vmem:[#allocation7 + $0x388] sm:$0xff]  ;;  %v246_v14 = vld [vmem:[#allocation7 + $0x398] sm:$0xff]  ;;  %p1161_p8 = scmp.lt.s32.totalorder %s1155_s19, %s1155_s19 }
  0x3b   :  { %262 = vmatpush1.msra.mxu0 %v251_v7  ;;  %333 = vmatpush1.msra.mxu1 %v253_v8  ;;  %v243_v15 = vld [vmem:[#allocation7 + $0x380] sm:$0xff]  ;;  %v245_v16 = vld [vmem:[#allocation7 + $0x390] sm:$0xff]  ;;  %v240_v17 = vld [vmem:[#allocation7 + $0x368] sm:$0xff] }
  0x3c   :  { %263 = vmatprep.subr.mxu0 %v248_v9  ;;  %334 = vmatprep.subr.mxu1 %v250_v10  ;;  %v242_v18 = vld [vmem:[#allocation7 + $0x378] sm:$0xff]  ;;  %v239_v19 = vld [vmem:[#allocation7 + $0x360] sm:$0xff]  ;;  %v241_v20 = vld [vmem:[#allocation7 + $0x370] sm:$0xff]  ;;  %p1162_p9 = por %p1161_p8, %p1160_p7 }
  0x3d   :  { %264 = vmatpush1.msra.mxu0 %v247_v11  ;;  %335 = vmatpush1.msra.mxu1 %v249_v12  ;;  %v236_v21 = vld [vmem:[#allocation7 + $0x348] sm:$0xff]  ;;  %v238_v22 = vld [vmem:[#allocation7 + $0x358] sm:$0xff]  ;;  %v235_v23 = vld [vmem:[#allocation7 + $0x340] sm:$0xff] }
  0x3e   :  { %265 = vmatprep.subr.mxu0 %v244_v13  ;;  %336 = vmatprep.subr.mxu1 %v246_v14  ;;  %v237_v24 = vld [vmem:[#allocation7 + $0x350] sm:$0xff]  ;;  %v232_v25 = vld [vmem:[#allocation7 + $0x328] sm:$0xff]  ;;  %v234_v26 = vld [vmem:[#allocation7 + $0x338] sm:$0xff]  ;;  %p1163_p10 = pnand %p1162_p9, %p1156_p6 }
  0x3f   :  { %266 = vmatpush1.msra.mxu0 %v243_v15  ;;  %337 = vmatpush1.msra.mxu1 %v245_v16  ;;  %v231_v27 = vld [vmem:[#allocation7 + $0x320] sm:$0xff]  ;;  %v233_v28 = vld [vmem:[#allocation7 + $0x330] sm:$0xff]  ;;  %v228_v29 = vld [vmem:[#allocation7 + $0x308] sm:$0xff] }
  0x40   :  { %267 = vmatprep.subr.mxu0 %v240_v17  ;;  %338 = vmatprep.subr.mxu1 %v242_v18  ;;  %v230_v30 = vld [vmem:[#allocation7 + $0x318] sm:$0xff]  ;;  %v227_v31 = vld [vmem:[#allocation7 + $0x300] sm:$0xff]  ;;  %v229_v32 = vld [vmem:[#allocation7 + $0x310] sm:$0xff] }
  0x41   :  { %268 = vmatpush1.msra.mxu0 %v239_v19  ;;  %339 = vmatpush1.msra.mxu1 %v241_v20  ;;  %v224_v33 = vld [vmem:[#allocation7 + $0x2e8] sm:$0xff]  ;;  %v226_v34 = vld [vmem:[#allocation7 + $0x2f8] sm:$0xff]  ;;  %v223_v35 = vld [vmem:[#allocation7 + $0x2e0] sm:$0xff] }
  0x42   :  { %269 = vmatprep.subr.mxu0 %v236_v21  ;;  %340 = vmatprep.subr.mxu1 %v238_v22  ;;  %v225_v36 = vld [vmem:[#allocation7 + $0x2f0] sm:$0xff]  ;;  %v220_v37 = vld [vmem:[#allocation7 + $0x2c8] sm:$0xff]  ;;  %v222_v38 = vld [vmem:[#allocation7 + $0x2d8] sm:$0xff] }
  0x43   :  { %270 = vmatpush1.msra.mxu0 %v235_v23  ;;  %341 = vmatpush1.msra.mxu1 %v237_v24  ;;  %v219_v39 = vld [vmem:[#allocation7 + $0x2c0] sm:$0xff]  ;;  %v221_v40 = vld [vmem:[#allocation7 + $0x2d0] sm:$0xff]  ;;  %v216_v41 = vld [vmem:[#allocation7 + $0x2a8] sm:$0xff] }
  0x44   :  { %271 = vmatprep.subr.mxu0 %v232_v25  ;;  %342 = vmatprep.subr.mxu1 %v234_v26  ;;  %v218_v42 = vld [vmem:[#allocation7 + $0x2b8] sm:$0xff]  ;;  %v215_v43 = vld [vmem:[#allocation7 + $0x2a0] sm:$0xff]  ;;  %v217_v44 = vld [vmem:[#allocation7 + $0x2b0] sm:$0xff] }
  0x45   :  { %272 = vmatpush1.msra.mxu0 %v231_v27  ;;  %343 = vmatpush1.msra.mxu1 %v233_v28  ;;  %v212_v45 = vld [vmem:[#allocation7 + $0x288] sm:$0xff]  ;;  %v214_v46 = vld [vmem:[#allocation7 + $0x298] sm:$0xff]  ;;  %v211_v47 = vld [vmem:[#allocation7 + $0x280] sm:$0xff] }
  0x46   :  { %273 = vmatprep.subr.mxu0 %v228_v29  ;;  %344 = vmatprep.subr.mxu1 %v230_v30  ;;  %v213_v48 = vld [vmem:[#allocation7 + $0x290] sm:$0xff]  ;;  %v208_v49 = vld [vmem:[#allocation7 + $0x268] sm:$0xff]  ;;  %v210_v50 = vld [vmem:[#allocation7 + $0x278] sm:$0xff] }
  0x47   :  { %274 = vmatpush1.msra.mxu0 %v227_v31  ;;  %345 = vmatpush1.msra.mxu1 %v229_v32  ;;  %v207_v51 = vld [vmem:[#allocation7 + $0x260] sm:$0xff]  ;;  %v209_v52 = vld [vmem:[#allocation7 + $0x270] sm:$0xff]  ;;  %v204_v53 = vld [vmem:[#allocation7 + $0x248] sm:$0xff] }
  0x48   :  { %275 = vmatprep.subr.mxu0 %v224_v33  ;;  %346 = vmatprep.subr.mxu1 %v226_v34  ;;  %v206_v54 = vld [vmem:[#allocation7 + $0x258] sm:$0xff]  ;;  %v203_v55 = vld [vmem:[#allocation7 + $0x240] sm:$0xff]  ;;  %v205_v56 = vld [vmem:[#allocation7 + $0x250] sm:$0xff] }
  0x49   :  { %276 = vmatpush1.msra.mxu0 %v223_v35  ;;  %347 = vmatpush1.msra.mxu1 %v225_v36  ;;  %v200_v57 = vld [vmem:[#allocation7 + $0x228] sm:$0xff]  ;;  %v202_v58 = vld [vmem:[#allocation7 + $0x238] sm:$0xff]  ;;  %v199_v59 = vld [vmem:[#allocation7 + $0x220] sm:$0xff] }
  0x4a   :  { %277 = vmatprep.subr.mxu0 %v220_v37  ;;  %348 = vmatprep.subr.mxu1 %v222_v38  ;;  %v201_v60 = vld [vmem:[#allocation7 + $0x230] sm:$0xff]  ;;  %v196_v61 = vld [vmem:[#allocation7 + $0x208] sm:$0xff]  ;;  %v198_v62 = vld [vmem:[#allocation7 + $0x218] sm:$0xff] }
  0x4b   :  { %278 = vmatpush1.msra.mxu0 %v219_v39  ;;  %349 = vmatpush1.msra.mxu1 %v221_v40  ;;  %v195_v63 = vld [vmem:[#allocation7 + $0x200] sm:$0xff]  ;;  %v197_v1 = vld [vmem:[#allocation7 + $0x210] sm:$0xff]  ;;  %v192_v3 = vld [vmem:[#allocation7 + $0x1e8] sm:$0xff] }
  0x4c   :  { %279 = vmatprep.subr.mxu0 %v216_v41  ;;  %350 = vmatprep.subr.mxu1 %v218_v42  ;;  %v1265_v2 = vld [vmem:[#allocation5] sm:$0xff]  ;;  %v194_v4 = vld [vmem:[#allocation7 + $0x1f8] sm:$0xff]  ;;  %v191_v5 = vld [vmem:[#allocation7 + $0x1e0] sm:$0xff] }
  0x4d   :  { %280 = vmatpush1.msra.mxu0 %v215_v43  ;;  %351 = vmatpush1.msra.mxu1 %v217_v44  ;;  %v193_v6 = vld [vmem:[#allocation7 + $0x1f0] sm:$0xff]  ;;  %v188_v7 = vld [vmem:[#allocation7 + $0x1c8] sm:$0xff]  ;;  %v190_v8 = vld [vmem:[#allocation7 + $0x1d8] sm:$0xff] }
  0x4e   :  { %281 = vmatprep.subr.mxu0 %v212_v45  ;;  %352 = vmatprep.subr.mxu1 %v214_v46  ;;  %v187_v9 = vld [vmem:[#allocation7 + $0x1c0] sm:$0xff]  ;;  %v189_v10 = vld [vmem:[#allocation7 + $0x1d0] sm:$0xff]  ;;  %v184_v11 = vld [vmem:[#allocation7 + $0x1a8] sm:$0xff] }
  0x4f   :  { %282 = vmatpush1.msra.mxu0 %v211_v47  ;;  %353 = vmatpush1.msra.mxu1 %v213_v48  ;;  %v186_v12 = vld [vmem:[#allocation7 + $0x1b8] sm:$0xff]  ;;  %v183_v13 = vld [vmem:[#allocation7 + $0x1a0] sm:$0xff]  ;;  %v185_v14 = vld [vmem:[#allocation7 + $0x1b0] sm:$0xff] }
  0x50   :  { %283 = vmatprep.subr.mxu0 %v208_v49  ;;  %354 = vmatprep.subr.mxu1 %v210_v50  ;;  %v180_v15 = vld [vmem:[#allocation7 + $0x188] sm:$0xff]  ;;  %v182_v16 = vld [vmem:[#allocation7 + $0x198] sm:$0xff]  ;;  %v179_v17 = vld [vmem:[#allocation7 + $0x180] sm:$0xff] }
  0x51   :  { %284 = vmatpush1.msra.mxu0 %v207_v51  ;;  %355 = vmatpush1.msra.mxu1 %v209_v52  ;;  %v181_v18 = vld [vmem:[#allocation7 + $0x190] sm:$0xff]  ;;  %v176_v19 = vld [vmem:[#allocation7 + $0x168] sm:$0xff]  ;;  %v178_v20 = vld [vmem:[#allocation7 + $0x178] sm:$0xff] }
  0x52   :  { %285 = vmatprep.subr.mxu0 %v204_v53  ;;  %356 = vmatprep.subr.mxu1 %v206_v54  ;;  %v175_v21 = vld [vmem:[#allocation7 + $0x160] sm:$0xff]  ;;  %v177_v22 = vld [vmem:[#allocation7 + $0x170] sm:$0xff]  ;;  %v172_v23 = vld [vmem:[#allocation7 + $0x148] sm:$0xff] }
  0x53   :  { %286 = vmatpush1.msra.mxu0 %v203_v55  ;;  %357 = vmatpush1.msra.mxu1 %v205_v56  ;;  %v174_v24 = vld [vmem:[#allocation7 + $0x158] sm:$0xff]  ;;  %v171_v25 = vld [vmem:[#allocation7 + $0x140] sm:$0xff]  ;;  %v173_v26 = vld [vmem:[#allocation7 + $0x150] sm:$0xff] }
  0x54   :  { %287 = vmatprep.subr.mxu0 %v200_v57  ;;  %358 = vmatprep.subr.mxu1 %v202_v58  ;;  %v168_v27 = vld [vmem:[#allocation7 + $0x128] sm:$0xff]  ;;  %v170_v28 = vld [vmem:[#allocation7 + $0x138] sm:$0xff]  ;;  %v167_v29 = vld [vmem:[#allocation7 + $0x120] sm:$0xff] }
  0x55   :  { %288 = vmatpush1.msra.mxu0 %v199_v59  ;;  %359 = vmatpush1.msra.mxu1 %v201_v60  ;;  %v169_v30 = vld [vmem:[#allocation7 + $0x130] sm:$0xff]  ;;  %v164_v31 = vld [vmem:[#allocation7 + $0x108] sm:$0xff]  ;;  %v166_v32 = vld [vmem:[#allocation7 + $0x118] sm:$0xff] }
  0x56   :  { %289 = vmatprep.subr.mxu0 %v196_v61  ;;  %360 = vmatprep.subr.mxu1 %v198_v62  ;;  %v163_v33 = vld [vmem:[#allocation7 + $0x100] sm:$0xff]  ;;  %v165_v34 = vld [vmem:[#allocation7 + $0x110] sm:$0xff]  ;;  %v160_v35 = vld [vmem:[#allocation7 + $0xe8] sm:$0xff] }
  0x57   :  { %290 = vmatpush1.msra.mxu0 %v195_v63  ;;  %361 = vmatpush1.msra.mxu1 %v197_v1  ;;  %v162_v36 = vld [vmem:[#allocation7 + $0xf8] sm:$0xff]  ;;  %v159_v37 = vld [vmem:[#allocation7 + $0xe0] sm:$0xff]  ;;  %v161_v38 = vld [vmem:[#allocation7 + $0xf0] sm:$0xff] }
  0x58   :  { %324 = vmatmul.mubr.f32.vlgmr.msra.gmra.mxu0 %v1265_v2  ;;  %401 = vmatprep.subr.mxu0 %v192_v3  ;;  %v156_v39 = vld [vmem:[#allocation7 + $0xc8] sm:$0xff]  ;;  %v158_v40 = vld [vmem:[#allocation7 + $0xd8] sm:$0xff]  ;;  %v155_v41 = vld [vmem:[#allocation7 + $0xc0] sm:$0xff] }
  0x59   :  { %472 = vmatprep.subr.mxu1 %v194_v4  ;;  %395 = vmatmul.mubr.f32.vlgmr.msra.gmra.mxu1 %v1265_v2  ;;  %v157_v42 = vld [vmem:[#allocation7 + $0xd0] sm:$0xff]  ;;  %v152_v43 = vld [vmem:[#allocation7 + $0xa8] sm:$0xff]  ;;  %v154_v44 = vld [vmem:[#allocation7 + $0xb8] sm:$0xff] }
  0x5a   :  { %402 = vmatpush1.msra.mxu0 %v191_v5  ;;  %473 = vmatpush1.msra.mxu1 %v193_v6  ;;  %v151_v45 = vld [vmem:[#allocation7 + $0xa0] sm:$0xff]  ;;  %v153_v46 = vld [vmem:[#allocation7 + $0xb0] sm:$0xff]  ;;  %v148_v47 = vld [vmem:[#allocation7 + $0x88] sm:$0xff] }
  0x5b   :  { %403 = vmatprep.subr.mxu0 %v188_v7  ;;  %474 = vmatprep.subr.mxu1 %v190_v8  ;;  %v150_v48 = vld [vmem:[#allocation7 + $0x98] sm:$0xff]  ;;  %v147_v49 = vld [vmem:[#allocation7 + $0x80] sm:$0xff]  ;;  %v149_v50 = vld [vmem:[#allocation7 + $0x90] sm:$0xff] }
  0x5c   :  { %404 = vmatpush1.msra.mxu0 %v187_v9  ;;  %475 = vmatpush1.msra.mxu1 %v189_v10  ;;  %v144_v51 = vld [vmem:[#allocation7 + $0x68] sm:$0xff]  ;;  %v146_v52 = vld [vmem:[#allocation7 + $0x78] sm:$0xff]  ;;  %v143_v53 = vld [vmem:[#allocation7 + $0x60] sm:$0xff] }
  0x5d   :  { %405 = vmatprep.subr.mxu0 %v184_v11  ;;  %476 = vmatprep.subr.mxu1 %v186_v12  ;;  %v145_v54 = vld [vmem:[#allocation7 + $0x70] sm:$0xff]  ;;  %v140_v55 = vld [vmem:[#allocation7 + $0x48] sm:$0xff]  ;;  %v142_v56 = vld [vmem:[#allocation7 + $0x58] sm:$0xff] }
  0x5e   :  { %406 = vmatpush1.msra.mxu0 %v183_v13  ;;  %477 = vmatpush1.msra.mxu1 %v185_v14  ;;  %v139_v57 = vld [vmem:[#allocation7 + $0x40] sm:$0xff]  ;;  %v141_v58 = vld [vmem:[#allocation7 + $0x50] sm:$0xff]  ;;  %v136_v59 = vld [vmem:[#allocation7 + $0x28] sm:$0xff] }
  0x5f   :  { %407 = vmatprep.subr.mxu0 %v180_v15  ;;  %478 = vmatprep.subr.mxu1 %v182_v16  ;;  %v138_v60 = vld [vmem:[#allocation7 + $0x38] sm:$0xff]  ;;  %v135_v61 = vld [vmem:[#allocation7 + $0x20] sm:$0xff]  ;;  %v137_v62 = vld [vmem:[#allocation7 + $0x30] sm:$0xff] }
  0x60   :  { %408 = vmatpush1.msra.mxu0 %v179_v17  ;;  %479 = vmatpush1.msra.mxu1 %v181_v18  ;;  %v132_v63 = vld [vmem:[#allocation7 + $0x8] sm:$0xff]  ;;  %v134_v1 = vld [vmem:[#allocation7 + $0x18] sm:$0xff]  ;;  %v131_v3 = vld [vmem:[#allocation7] sm:$0xff] }
  0x61   :  { %409 = vmatprep.subr.mxu0 %v176_v19  ;;  %480 = vmatprep.subr.mxu1 %v178_v20  ;;  %v133_v4 = vld [vmem:[#allocation7 + $0x10] sm:$0xff]  ;;  %v130_v5 = vld [vmem:[#allocation2] sm:$0xff]  ;;  %v691_v7 = vld [vmem:[#allocation7 + $0x7e0] sm:$0xff] }
  0x62   :  { %410 = vmatpush1.msra.mxu0 %v175_v21  ;;  %481 = vmatpush1.msra.mxu1 %v177_v22  ;;  %v692_v6 = vld [vmem:[#allocation7 + $0x7e8] sm:$0xff]  ;;  %v694_v8 = vld [vmem:[#allocation7 + $0x7f8] sm:$0xff]  ;;  %v693_v10 = vld [vmem:[#allocation7 + $0x7f0] sm:$0xff] }
  0x63   :  { %411 = vmatprep.subr.mxu0 %v172_v23  ;;  %482 = vmatprep.subr.mxu1 %v174_v24  ;;  %v688_v9 = vld [vmem:[#allocation7 + $0x7c8] sm:$0xff]  ;;  %v687_v11 = vld [vmem:[#allocation7 + $0x7c0] sm:$0xff]  ;;  %v690_v12 = vld [vmem:[#allocation7 + $0x7d8] sm:$0xff] }
  0x64   :  { %412 = vmatpush1.msra.mxu0 %v171_v25  ;;  %483 = vmatpush1.msra.mxu1 %v173_v26  ;;  %v684_v13 = vld [vmem:[#allocation7 + $0x7a8] sm:$0xff]  ;;  %v689_v14 = vld [vmem:[#allocation7 + $0x7d0] sm:$0xff]  ;;  %v683_v15 = vld [vmem:[#allocation7 + $0x7a0] sm:$0xff] }
  0x65   :  { %413 = vmatprep.subr.mxu0 %v168_v27  ;;  %484 = vmatprep.subr.mxu1 %v170_v28  ;;  %v686_v16 = vld [vmem:[#allocation7 + $0x7b8] sm:$0xff]  ;;  %v680_v17 = vld [vmem:[#allocation7 + $0x788] sm:$0xff]  ;;  %v685_v18 = vld [vmem:[#allocation7 + $0x7b0] sm:$0xff] }
  0x66   :  { %414 = vmatpush1.msra.mxu0 %v167_v29  ;;  %485 = vmatpush1.msra.mxu1 %v169_v30  ;;  %v679_v19 = vld [vmem:[#allocation7 + $0x780] sm:$0xff]  ;;  %v682_v20 = vld [vmem:[#allocation7 + $0x798] sm:$0xff]  ;;  %v676_v21 = vld [vmem:[#allocation7 + $0x768] sm:$0xff] }
  0x67   :  { %415 = vmatprep.subr.mxu0 %v164_v31  ;;  %486 = vmatprep.subr.mxu1 %v166_v32  ;;  %v681_v22 = vld [vmem:[#allocation7 + $0x790] sm:$0xff]  ;;  %v675_v23 = vld [vmem:[#allocation7 + $0x760] sm:$0xff]  ;;  %v678_v24 = vld [vmem:[#allocation7 + $0x778] sm:$0xff] }
  0x68   :  { %416 = vmatpush1.msra.mxu0 %v163_v33  ;;  %487 = vmatpush1.msra.mxu1 %v165_v34  ;;  %v672_v25 = vld [vmem:[#allocation7 + $0x748] sm:$0xff]  ;;  %v677_v26 = vld [vmem:[#allocation7 + $0x770] sm:$0xff]  ;;  %v671_v27 = vld [vmem:[#allocation7 + $0x740] sm:$0xff] }
  0x69   :  { %417 = vmatprep.subr.mxu0 %v160_v35  ;;  %488 = vmatprep.subr.mxu1 %v162_v36  ;;  %v674_v28 = vld [vmem:[#allocation7 + $0x758] sm:$0xff]  ;;  %v668_v29 = vld [vmem:[#allocation7 + $0x728] sm:$0xff]  ;;  %v673_v30 = vld [vmem:[#allocation7 + $0x750] sm:$0xff] }
  0x6a   :  { %418 = vmatpush1.msra.mxu0 %v159_v37  ;;  %489 = vmatpush1.msra.mxu1 %v161_v38  ;;  %v667_v31 = vld [vmem:[#allocation7 + $0x720] sm:$0xff]  ;;  %v670_v32 = vld [vmem:[#allocation7 + $0x738] sm:$0xff]  ;;  %v664_v33 = vld [vmem:[#allocation7 + $0x708] sm:$0xff] }
  0x6b   :  { %419 = vmatprep.subr.mxu0 %v156_v39  ;;  %490 = vmatprep.subr.mxu1 %v158_v40  ;;  %v669_v34 = vld [vmem:[#allocation7 + $0x730] sm:$0xff]  ;;  %v663_v35 = vld [vmem:[#allocation7 + $0x700] sm:$0xff]  ;;  %v666_v36 = vld [vmem:[#allocation7 + $0x718] sm:$0xff] }
  0x6c   :  { %420 = vmatpush1.msra.mxu0 %v155_v41  ;;  %491 = vmatpush1.msra.mxu1 %v157_v42  ;;  %v660_v37 = vld [vmem:[#allocation7 + $0x6e8] sm:$0xff]  ;;  %v665_v38 = vld [vmem:[#allocation7 + $0x710] sm:$0xff]  ;;  %v659_v39 = vld [vmem:[#allocation7 + $0x6e0] sm:$0xff] }
  0x6d   :  { %421 = vmatprep.subr.mxu0 %v152_v43  ;;  %492 = vmatprep.subr.mxu1 %v154_v44  ;;  %v662_v40 = vld [vmem:[#allocation7 + $0x6f8] sm:$0xff]  ;;  %v656_v41 = vld [vmem:[#allocation7 + $0x6c8] sm:$0xff]  ;;  %v661_v42 = vld [vmem:[#allocation7 + $0x6f0] sm:$0xff] }
  0x6e   :  { %422 = vmatpush1.msra.mxu0 %v151_v45  ;;  %493 = vmatpush1.msra.mxu1 %v153_v46  ;;  %v655_v43 = vld [vmem:[#allocation7 + $0x6c0] sm:$0xff]  ;;  %v658_v44 = vld [vmem:[#allocation7 + $0x6d8] sm:$0xff]  ;;  %v652_v45 = vld [vmem:[#allocation7 + $0x6a8] sm:$0xff] }
  0x6f   :  { %423 = vmatprep.subr.mxu0 %v148_v47  ;;  %494 = vmatprep.subr.mxu1 %v150_v48  ;;  %v657_v46 = vld [vmem:[#allocation7 + $0x6d0] sm:$0xff]  ;;  %v651_v47 = vld [vmem:[#allocation7 + $0x6a0] sm:$0xff]  ;;  %v654_v48 = vld [vmem:[#allocation7 + $0x6b8] sm:$0xff] }
  0x70   :  { %424 = vmatpush1.msra.mxu0 %v147_v49  ;;  %495 = vmatpush1.msra.mxu1 %v149_v50  ;;  %v648_v49 = vld [vmem:[#allocation7 + $0x688] sm:$0xff]  ;;  %v653_v50 = vld [vmem:[#allocation7 + $0x6b0] sm:$0xff] }
  0x71   :  { %425 = vmatprep.subr.mxu0 %v144_v51  ;;  %496 = vmatprep.subr.mxu1 %v146_v52  ;;  %v647_v51 = vld [vmem:[#allocation7 + $0x680] sm:$0xff]  ;;  %v650_v52 = vld [vmem:[#allocation7 + $0x698] sm:$0xff] }
  0x72   :  { %426 = vmatpush1.msra.mxu0 %v143_v53  ;;  %497 = vmatpush1.msra.mxu1 %v145_v54  ;;  %v644_v53 = vld [vmem:[#allocation7 + $0x668] sm:$0xff]  ;;  %v649_v54 = vld [vmem:[#allocation7 + $0x690] sm:$0xff] }
  0x73   :  { %427 = vmatprep.subr.mxu0 %v140_v55  ;;  %498 = vmatprep.subr.mxu1 %v142_v56  ;;  %v643_v55 = vld [vmem:[#allocation7 + $0x660] sm:$0xff]  ;;  %v646_v56 = vld [vmem:[#allocation7 + $0x678] sm:$0xff] }
  0x74   :  { %428 = vmatpush1.msra.mxu0 %v139_v57  ;;  %499 = vmatpush1.msra.mxu1 %v141_v58  ;;  %v640_v57 = vld [vmem:[#allocation7 + $0x648] sm:$0xff]  ;;  %v645_v58 = vld [vmem:[#allocation7 + $0x670] sm:$0xff] }
  0x75   :  { %429 = vmatprep.subr.mxu0 %v136_v59  ;;  %500 = vmatprep.subr.mxu1 %v138_v60  ;;  %v639_v59 = vld [vmem:[#allocation7 + $0x640] sm:$0xff]  ;;  %v642_v60 = vld [vmem:[#allocation7 + $0x658] sm:$0xff] }
  0x76   :  { %430 = vmatpush1.msra.mxu0 %v135_v61  ;;  %501 = vmatpush1.msra.mxu1 %v137_v62  ;;  %v636_v61 = vld [vmem:[#allocation7 + $0x628] sm:$0xff]  ;;  %v641_v62 = vld [vmem:[#allocation7 + $0x650] sm:$0xff] }
  0x77   :  { %431 = vmatprep.subr.mxu0 %v132_v63  ;;  %502 = vmatprep.subr.mxu1 %v134_v1  ;;  %v635_v63 = vld [vmem:[#allocation7 + $0x620] sm:$0xff]  ;;  %v638_v1 = vld [vmem:[#allocation7 + $0x638] sm:$0xff] }
  0x78   :  { %432 = vmatpush1.msra.mxu0 %v131_v3  ;;  %465 = vmatprep.mubr.f32.mxu0 %v1215_v0  ;;  %v632_v3 = vld [vmem:[#allocation7 + $0x608] sm:$0xff] }
  0x79   :  { %503 = vmatpush1.msra.mxu1 %v133_v4  ;;  %536 = vmatprep.mubr.f32.mxu1 %v1215_v0  ;;  %v637_v4 = vld [vmem:[#allocation7 + $0x630] sm:$0xff] }
  0x7a   :  { %466 = vmatmul.mubr.f32.vlgmr.msra.gmra.mxu0 %v130_v5  ;;  %537 = vmatmul.mubr.f32.vlgmr.msra.gmra.mxu1 %v130_v5  ;;  %v631_v5 = vld [vmem:[#allocation7 + $0x600] sm:$0xff] }
  0x7b   :  { %759 = vmatprep.mubr.f32.mxu0 %v1215_v0  ;;  %830 = vmatprep.mubr.f32.mxu1 %v1215_v0 }
  0x7c   :  { %695 = vmatprep.subr.mxu0 %v692_v6  ;;  %766 = vmatprep.subr.mxu1 %v694_v8  ;;  %v634_v6 = vld [vmem:[#allocation7 + $0x618] sm:$0xff]  ;;  %v633_v8 = vld [vmem:[#allocation7 + $0x610] sm:$0xff] }
  0x7d   :  { %696 = vmatpush1.msra.mxu0 %v691_v7  ;;  %767 = vmatpush1.msra.mxu1 %v693_v10  ;;  %v1273_v7 = vld [vmem:[#allocation5 + $0x8] sm:$0xff] }
  0x7e   :  { %697 = vmatprep.subr.mxu0 %v688_v9  ;;  %768 = vmatprep.subr.mxu1 %v690_v12  ;;  %v628_v9 = vld [vmem:[#allocation7 + $0x5e8] sm:$0xff]  ;;  %v630_v10 = vld [vmem:[#allocation7 + $0x5f8] sm:$0xff]  ;;  %v629_v12 = vld [vmem:[#allocation7 + $0x5f0] sm:$0xff] }
  0x7f   :  { %698 = vmatpush1.msra.mxu0 %v687_v11  ;;  %769 = vmatpush1.msra.mxu1 %v689_v14  ;;  %v627_v11 = vld [vmem:[#allocation7 + $0x5e0] sm:$0xff]  ;;  %v626_v14 = vld [vmem:[#allocation7 + $0x5d8] sm:$0xff] }
  0x80   :  { %699 = vmatprep.subr.mxu0 %v684_v13  ;;  %770 = vmatprep.subr.mxu1 %v686_v16  ;;  %v624_v13 = vld [vmem:[#allocation7 + $0x5c8] sm:$0xff]  ;;  %v625_v16 = vld [vmem:[#allocation7 + $0x5d0] sm:$0xff] }
  0x81   :  { %700 = vmatpush1.msra.mxu0 %v683_v15  ;;  %771 = vmatpush1.msra.mxu1 %v685_v18  ;;  %v623_v15 = vld [vmem:[#allocation7 + $0x5c0] sm:$0xff]  ;;  %v622_v18 = vld [vmem:[#allocation7 + $0x5b8] sm:$0xff] }
  0x82   :  { %701 = vmatprep.subr.mxu0 %v680_v17  ;;  %772 = vmatprep.subr.mxu1 %v682_v20  ;;  %v620_v17 = vld [vmem:[#allocation7 + $0x5a8] sm:$0xff]  ;;  %v621_v20 = vld [vmem:[#allocation7 + $0x5b0] sm:$0xff] }
  0x83   :  { %702 = vmatpush1.msra.mxu0 %v679_v19  ;;  %773 = vmatpush1.msra.mxu1 %v681_v22  ;;  %v619_v19 = vld [vmem:[#allocation7 + $0x5a0] sm:$0xff]  ;;  %v618_v22 = vld [vmem:[#allocation7 + $0x598] sm:$0xff] }
  0x84   :  { %703 = vmatprep.subr.mxu0 %v676_v21  ;;  %774 = vmatprep.subr.mxu1 %v678_v24  ;;  %v616_v21 = vld [vmem:[#allocation7 + $0x588] sm:$0xff]  ;;  %v617_v24 = vld [vmem:[#allocation7 + $0x590] sm:$0xff] }
  0x85   :  { %704 = vmatpush1.msra.mxu0 %v675_v23  ;;  %775 = vmatpush1.msra.mxu1 %v677_v26  ;;  %v615_v23 = vld [vmem:[#allocation7 + $0x580] sm:$0xff]  ;;  %v614_v26 = vld [vmem:[#allocation7 + $0x578] sm:$0xff] }
  0x86   :  { %705 = vmatprep.subr.mxu0 %v672_v25  ;;  %776 = vmatprep.subr.mxu1 %v674_v28  ;;  %v612_v25 = vld [vmem:[#allocation7 + $0x568] sm:$0xff]  ;;  %v613_v28 = vld [vmem:[#allocation7 + $0x570] sm:$0xff] }
  0x87   :  { %706 = vmatpush1.msra.mxu0 %v671_v27  ;;  %777 = vmatpush1.msra.mxu1 %v673_v30  ;;  %v611_v27 = vld [vmem:[#allocation7 + $0x560] sm:$0xff]  ;;  %v610_v30 = vld [vmem:[#allocation7 + $0x558] sm:$0xff] }
  0x88   :  { %707 = vmatprep.subr.mxu0 %v668_v29  ;;  %778 = vmatprep.subr.mxu1 %v670_v32  ;;  %v608_v29 = vld [vmem:[#allocation7 + $0x548] sm:$0xff]  ;;  %v609_v32 = vld [vmem:[#allocation7 + $0x550] sm:$0xff] }
  0x89   :  { %708 = vmatpush1.msra.mxu0 %v667_v31  ;;  %779 = vmatpush1.msra.mxu1 %v669_v34  ;;  %v607_v31 = vld [vmem:[#allocation7 + $0x540] sm:$0xff]  ;;  %v606_v34 = vld [vmem:[#allocation7 + $0x538] sm:$0xff] }
  0x8a   :  { %709 = vmatprep.subr.mxu0 %v664_v33  ;;  %780 = vmatprep.subr.mxu1 %v666_v36  ;;  %v604_v33 = vld [vmem:[#allocation7 + $0x528] sm:$0xff]  ;;  %v605_v36 = vld [vmem:[#allocation7 + $0x530] sm:$0xff] }
  0x8b   :  { %710 = vmatpush1.msra.mxu0 %v663_v35  ;;  %781 = vmatpush1.msra.mxu1 %v665_v38  ;;  %v603_v35 = vld [vmem:[#allocation7 + $0x520] sm:$0xff]  ;;  %v602_v38 = vld [vmem:[#allocation7 + $0x518] sm:$0xff] }
  0x8c   :  { %711 = vmatprep.subr.mxu0 %v660_v37  ;;  %782 = vmatprep.subr.mxu1 %v662_v40  ;;  %v600_v37 = vld [vmem:[#allocation7 + $0x508] sm:$0xff]  ;;  %v601_v40 = vld [vmem:[#allocation7 + $0x510] sm:$0xff] }
  0x8d   :  { %712 = vmatpush1.msra.mxu0 %v659_v39  ;;  %783 = vmatpush1.msra.mxu1 %v661_v42  ;;  %v599_v39 = vld [vmem:[#allocation7 + $0x500] sm:$0xff]  ;;  %v598_v42 = vld [vmem:[#allocation7 + $0x4f8] sm:$0xff] }
  0x8e   :  { %713 = vmatprep.subr.mxu0 %v656_v41  ;;  %784 = vmatprep.subr.mxu1 %v658_v44  ;;  %v596_v41 = vld [vmem:[#allocation7 + $0x4e8] sm:$0xff]  ;;  %v597_v44 = vld [vmem:[#allocation7 + $0x4f0] sm:$0xff] }
  0x8f   :  { %714 = vmatpush1.msra.mxu0 %v655_v43  ;;  %785 = vmatpush1.msra.mxu1 %v657_v46  ;;  %v595_v43 = vld [vmem:[#allocation7 + $0x4e0] sm:$0xff]  ;;  %v594_v46 = vld [vmem:[#allocation7 + $0x4d8] sm:$0xff] }
  0x90   :  { %715 = vmatprep.subr.mxu0 %v652_v45  ;;  %786 = vmatprep.subr.mxu1 %v654_v48  ;;  %v592_v45 = vld [vmem:[#allocation7 + $0x4c8] sm:$0xff]  ;;  %v593_v48 = vld [vmem:[#allocation7 + $0x4d0] sm:$0xff] }
  0x91   :  { %716 = vmatpush1.msra.mxu0 %v651_v47  ;;  %787 = vmatpush1.msra.mxu1 %v653_v50  ;;  %v591_v47 = vld [vmem:[#allocation7 + $0x4c0] sm:$0xff]  ;;  %v590_v50 = vld [vmem:[#allocation7 + $0x4b8] sm:$0xff] }
  0x92   :  { %717 = vmatprep.subr.mxu0 %v648_v49  ;;  %788 = vmatprep.subr.mxu1 %v650_v52  ;;  %v588_v49 = vld [vmem:[#allocation7 + $0x4a8] sm:$0xff]  ;;  %v589_v52 = vld [vmem:[#allocation7 + $0x4b0] sm:$0xff] }
  0x93   :  { %718 = vmatpush1.msra.mxu0 %v647_v51  ;;  %789 = vmatpush1.msra.mxu1 %v649_v54  ;;  %v587_v51 = vld [vmem:[#allocation7 + $0x4a0] sm:$0xff]  ;;  %v586_v54 = vld [vmem:[#allocation7 + $0x498] sm:$0xff] }
  0x94   :  { %719 = vmatprep.subr.mxu0 %v644_v53  ;;  %790 = vmatprep.subr.mxu1 %v646_v56  ;;  %v584_v53 = vld [vmem:[#allocation7 + $0x488] sm:$0xff]  ;;  %v585_v56 = vld [vmem:[#allocation7 + $0x490] sm:$0xff] }
  0x95   :  { %720 = vmatpush1.msra.mxu0 %v643_v55  ;;  %791 = vmatpush1.msra.mxu1 %v645_v58  ;;  %v583_v55 = vld [vmem:[#allocation7 + $0x480] sm:$0xff]  ;;  %v582_v58 = vld [vmem:[#allocation7 + $0x478] sm:$0xff] }
  0x96   :  { %721 = vmatprep.subr.mxu0 %v640_v57  ;;  %792 = vmatprep.subr.mxu1 %v642_v60  ;;  %v580_v57 = vld [vmem:[#allocation7 + $0x468] sm:$0xff]  ;;  %v581_v60 = vld [vmem:[#allocation7 + $0x470] sm:$0xff] }
  0x97   :  { %722 = vmatpush1.msra.mxu0 %v639_v59  ;;  %793 = vmatpush1.msra.mxu1 %v641_v62  ;;  %v579_v59 = vld [vmem:[#allocation7 + $0x460] sm:$0xff]  ;;  %v578_v62 = vld [vmem:[#allocation7 + $0x458] sm:$0xff] }
  0x98   :  { %723 = vmatprep.subr.mxu0 %v636_v61  ;;  %794 = vmatprep.subr.mxu1 %v638_v1  ;;  %v576_v61 = vld [vmem:[#allocation7 + $0x448] sm:$0xff]  ;;  %v577_v1 = vld [vmem:[#allocation7 + $0x450] sm:$0xff] }
  0x99   :  { %724 = vmatpush1.msra.mxu0 %v635_v63  ;;  %795 = vmatpush1.msra.mxu1 %v637_v4  ;;  %v575_v63 = vld [vmem:[#allocation7 + $0x440] sm:$0xff]  ;;  %v574_v4 = vld [vmem:[#allocation7 + $0x438] sm:$0xff] }
  0x9a   :  { %725 = vmatprep.subr.mxu0 %v632_v3  ;;  %796 = vmatprep.subr.mxu1 %v634_v6  ;;  %v572_v3 = vld [vmem:[#allocation7 + $0x428] sm:$0xff]  ;;  %v573_v6 = vld [vmem:[#allocation7 + $0x430] sm:$0xff] }
  0x9b   :  { %726 = vmatpush1.msra.mxu0 %v631_v5  ;;  %797 = vmatpush1.msra.mxu1 %v633_v8  ;;  %v571_v5 = vld [vmem:[#allocation7 + $0x420] sm:$0xff]  ;;  %v568_v8 = vld [vmem:[#allocation7 + $0x408] sm:$0xff] }
  0x9c   :  { %760 = vmatmul.mubr.f32.vlgmr.msra.gmra.mxu0 %v1273_v7  ;;  %837 = vmatprep.subr.mxu0 %v628_v9  ;;  %v570_v9 = vld [vmem:[#allocation7 + $0x418] sm:$0xff] }
  0x9d   :  { %908 = vmatprep.subr.mxu1 %v630_v10  ;;  %831 = vmatmul.mubr.f32.vlgmr.msra.gmra.mxu1 %v1273_v7  ;;  %v567_v10 = vld [vmem:[#allocation7 + $0x400] sm:$0xff] }
  0x9e   :  { %838 = vmatpush1.msra.mxu0 %v627_v11  ;;  %909 = vmatpush1.msra.mxu1 %v629_v12  ;;  %v569_v11 = vld [vmem:[#allocation7 + $0x410] sm:$0xff]  ;;  %v84_v12 = vlaneseq }
  0x9f   :  { %839 = vmatprep.subr.mxu0 %v624_v13  ;;  %910 = vmatprep.subr.mxu1 %v626_v14 }
  0xa0   :  { %840 = vmatpush1.msra.mxu0 %v623_v15  ;;  %911 = vmatpush1.msra.mxu1 %v625_v16  ;;  %v1279_v13 = vshrl.u32 %v84_v12, 7  ;;  %v82_v16 = vld [vmem:[#allocation8] sm:$0xf] }
  0xa1   :  { %841 = vmatprep.subr.mxu0 %v620_v17  ;;  %912 = vmatprep.subr.mxu1 %v622_v18 }
  0xa2   :  { %842 = vmatpush1.msra.mxu0 %v619_v19  ;;  %913 = vmatpush1.msra.mxu1 %v621_v20  ;;  %v86_v15 = vsub.s32 0, %v1279_v13 }
  0xa3   :  { %843 = vmatprep.subr.mxu0 %v616_v21  ;;  %914 = vmatprep.subr.mxu1 %v618_v22  ;;  %v90_v21 = vsub.s32 1, %v1279_v13 }
  0xa4   :  { %844 = vmatpush1.msra.mxu0 %v615_v23  ;;  %915 = vmatpush1.msra.mxu1 %v617_v24  ;;  %v87_v18 = vrot.slane %v82_v16, %v86_v15 }
  0xa5   :  { %845 = vmatprep.subr.mxu0 %v612_v25  ;;  %916 = vmatprep.subr.mxu1 %v614_v26  ;;  %v91_v25 = vrot.slane %v82_v16, %v90_v21 }
  0xa6   :  { %846 = vmatpush1.msra.mxu0 %v611_v27  ;;  %917 = vmatpush1.msra.mxu1 %v613_v28 }
  0xa7   :  { %847 = vmatprep.subr.mxu0 %v608_v29  ;;  %918 = vmatprep.subr.mxu1 %v610_v30 }
  0xa8   :  { %848 = vmatpush1.msra.mxu0 %v607_v31  ;;  %919 = vmatpush1.msra.mxu1 %v609_v32 }
  0xa9   :  { %849 = vmatprep.subr.mxu0 %v604_v33  ;;  %920 = vmatprep.subr.mxu1 %v606_v34  ;;  %v98_v33 = vsub.s32 3, %v1279_v13 }
  0xaa   :  { %850 = vmatpush1.msra.mxu0 %v603_v35  ;;  %921 = vmatpush1.msra.mxu1 %v605_v36  ;;  %v94_v35 = vsub.s32 2, %v1279_v13 }
  0xab   :  { %851 = vmatprep.subr.mxu0 %v600_v37  ;;  %922 = vmatprep.subr.mxu1 %v602_v38  ;;  %v99_v37 = vrot.slane %v82_v16, %v98_v33 }
  0xac   :  { %852 = vmatpush1.msra.mxu0 %v599_v39  ;;  %923 = vmatpush1.msra.mxu1 %v601_v40  ;;  %v95_v39 = vrot.slane %v82_v16, %v94_v35 }
  0xad   :  { %853 = vmatprep.subr.mxu0 %v596_v41  ;;  %924 = vmatprep.subr.mxu1 %v598_v42 }
  0xae   :  { %854 = vmatpush1.msra.mxu0 %v595_v43  ;;  %925 = vmatpush1.msra.mxu1 %v597_v44 }
  0xaf   :  { %855 = vmatprep.subr.mxu0 %v592_v45  ;;  %926 = vmatprep.subr.mxu1 %v594_v46 }
  0xb0   :  { %856 = vmatpush1.msra.mxu0 %v591_v47  ;;  %927 = vmatpush1.msra.mxu1 %v593_v48 }
  0xb1   :  { %857 = vmatprep.subr.mxu0 %v588_v49  ;;  %928 = vmatprep.subr.mxu1 %v590_v50 }
  0xb2   :  { %858 = vmatpush1.msra.mxu0 %v587_v51  ;;  %929 = vmatpush1.msra.mxu1 %v589_v52 }
  0xb3   :  { %859 = vmatprep.subr.mxu0 %v584_v53  ;;  %930 = vmatprep.subr.mxu1 %v586_v54  ;;  %v105_v54 = vld [vmem:[#allocation8 + $0x4] sm:$0xf] }
  0xb4   :  { %860 = vmatpush1.msra.mxu0 %v583_v55  ;;  %931 = vmatpush1.msra.mxu1 %v585_v56  ;;  %v110_v56 = vrot.slane %v105_v54, %v86_v15  ;;  %v118_v13 = vrot.slane %v105_v54, %v94_v35 }
  0xb5   :  { %861 = vmatprep.subr.mxu0 %v580_v57  ;;  %932 = vmatprep.subr.mxu1 %v582_v58 }
  0xb6   :  { %862 = vmatpush1.msra.mxu0 %v579_v59  ;;  %933 = vmatpush1.msra.mxu1 %v581_v60 }
  0xb7   :  { %863 = vmatprep.subr.mxu0 %v576_v61  ;;  %934 = vmatprep.subr.mxu1 %v578_v62  ;;  %v114_v62 = vrot.slane %v105_v54, %v90_v21 }
  0xb8   :  { %864 = vmatpush1.msra.mxu0 %v575_v63  ;;  %935 = vmatpush1.msra.mxu1 %v577_v1 }
  0xb9   :  { %865 = vmatprep.subr.mxu0 %v572_v3  ;;  %936 = vmatprep.subr.mxu1 %v574_v4 }
  0xba   :  { %866 = vmatpush1.msra.mxu0 %v571_v5  ;;  %937 = vmatpush1.msra.mxu1 %v573_v6 }
  0xbb   :  { %867 = vmatprep.subr.mxu0 %v568_v8  ;;  %938 = vmatprep.subr.mxu1 %v570_v9 }
  0xbc   :  { %868 = vmatpush1.msra.mxu0 %v567_v10  ;;  %901 = vmatprep.mubr.f32.mxu0 %v1215_v0 }
  0xbd   :  { %939 = vmatpush1.msra.mxu1 %v569_v11  ;;  %972 = vmatprep.mubr.f32.mxu1 %v1215_v0  ;;  %v122_v11 = vrot.slane %v105_v54, %v98_v33 }
 0x118   :  { %v325_v14 = vpop.f32.mrf.mxu0 }
 0x119   :  { %v396_v28 = vpop.f32.mrf.mxu1 }
 0x11a   :  { %v327_v17 = vpop.f32.mrf.mxu0 }
 0x11b   :  { %v398_v30 = vpop.f32.mrf.mxu1 }
 0x13a   :  { %v467_v19 = vpop.f32.mrf.mxu0  ;;  %v538_v32 = vpop.f32.mrf.mxu1 }
 0x13b   :  { %v468_v20 = vadd.f32 %v467_v19, %v325_v14  ;;  %v539_v40 = vadd.f32 %v538_v32, %v396_v28 }
 0x13c   :  { %v469_v22 = vpop.f32.mrf.mxu0  ;;  %v540_v34 = vpop.f32.mrf.mxu1 }
 0x13d   :  { %v543_v23 = vadd.f32 %v468_v20, %v87_v18  ;;  %v470_v26 = vadd.f32 %v469_v22, %v327_v17  ;;  %v541_v38 = vadd.f32 %v540_v34, %v398_v30  ;;  %v545_v44 = vadd.f32 %v539_v40, %v95_v39 }
 0x13f   :  { %v1038_v24 = vmul.f32 -1.442695, %v543_v23  ;;  %v544_v0 = vadd.f32 %v470_v26, %v91_v25  ;;  %v546_v42 = vadd.f32 %v541_v38, %v99_v37 }
 0x141   :  { %1055 = vpow2.f32 %v1038_v24  ;;  %v1039_v27 = vmul.f32 -1.442695, %v544_v0 }
 0x143   :  { %1057 = vpow2.f32 %v1039_v27 }
 0x14e   :  { %v1056_v29 = vpop.eup %1055 }
 0x14f   :  { %v550_v31 = vadd.f32 1.0, %v1056_v29 }
 0x150   :  { %v1058_v36 = vpop.eup %1057 }
 0x151   :  { %1059 = vrcp.f32 %v550_v31  ;;  %v556_v41 = vadd.f32 1.0, %v1058_v36 }
 0x153   :  { %1061 = vrcp.f32 %v556_v41 }
 0x15c   :  { %v761_v53 = vpop.f32.mrf.mxu0 }
 0x15d   :  { %v832_v4 = vpop.f32.mrf.mxu1 }
 0x15e   :  { %v1060_v43 = vpop.eup %1059  ;;  %v763_v55 = vpop.f32.mrf.mxu0 }
 0x15f   :  { %v559_v45 = vmul.f32 %v1060_v43, %v546_v42  ;;  %v834_v5 = vpop.f32.mrf.mxu1 }
 0x160   :  { %v1062_v47 = vpop.eup %1061 }
 0x161   :  { %v560_v46 = vadd.f32 %v559_v45, %v545_v44  ;;  %v562_v48 = vsub.f32 1.0, %v1062_v47  ;;  %v564_v51 = vmul.f32 %v1062_v47, %v1265_v2 }
 0x163   :  { %1063 = vtanh.f32 %v560_v46 }
 0x170   :  { %v1064_v49 = vpop.eup %1063 }
 0x171   :  { %v563_v50 = vmul.f32 %v1064_v49, %v562_v48 }
 0x173   :  { %v565_v52 = vadd.f32 %v564_v51, %v563_v50 }
 0x175   :  { %902 = vmatmul.mubr.f32.vlgmr.msra.gmra.mxu0 %v565_v52  ;;  %1003 = vst [vmem:[#allocation11] sm:$0xff] %v565_v52  ;;  %973 = vmatmul.mubr.f32.vlgmr.msra.gmra.mxu1 %v565_v52 }
 0x235   :  { %v903_v57 = vpop.f32.mrf.mxu0  ;;  %v974_v8 = vpop.f32.mrf.mxu1 }
 0x236   :  { %v904_v58 = vadd.f32 %v903_v57, %v761_v53  ;;  %v975_v14 = vadd.f32 %v974_v8, %v832_v4 }
 0x237   :  { %v905_v59 = vpop.f32.mrf.mxu0  ;;  %v976_v9 = vpop.f32.mrf.mxu1 }
 0x238   :  { %v979_v60 = vadd.f32 %v904_v58, %v110_v56  ;;  %v906_v63 = vadd.f32 %v905_v59, %v763_v55  ;;  %v977_v12 = vadd.f32 %v976_v9, %v834_v5  ;;  %v981_v18 = vadd.f32 %v975_v14, %v118_v13 }
 0x23a   :  { %v1040_v61 = vmul.f32 -1.442695, %v979_v60  ;;  %v980_v1 = vadd.f32 %v906_v63, %v114_v62  ;;  %v982_v16 = vadd.f32 %v977_v12, %v122_v11 }
 0x23c   :  { %1065 = vpow2.f32 %v1040_v61  ;;  %v1041_v3 = vmul.f32 -1.442695, %v980_v1 }
 0x23e   :  { %1067 = vpow2.f32 %v1041_v3 }
 0x249   :  { %v1066_v2 = vpop.eup %1065 }
 0x24a   :  { %v986_v6 = vadd.f32 1.0, %v1066_v2 }
 0x24b   :  { %v1068_v10 = vpop.eup %1067 }
 0x24c   :  { %1069 = vrcp.f32 %v986_v6  ;;  %v992_v15 = vadd.f32 1.0, %v1068_v10 }
 0x24e   :  { %1071 = vrcp.f32 %v992_v15 }
 0x259   :  { %v1070_v17 = vpop.eup %1069 }
 0x25a   :  { %v995_v19 = vmul.f32 %v1070_v17, %v982_v16 }
 0x25b   :  { %v1072_v21 = vpop.eup %1071 }
 0x25c   :  { %v996_v20 = vadd.f32 %v995_v19, %v981_v18  ;;  %v998_v22 = vsub.f32 1.0, %v1072_v21  ;;  %v1000_v25 = vmul.f32 %v1072_v21, %v1273_v7 }
 0x25e   :  { %1073 = vtanh.f32 %v996_v20 }
 0x26b   :  { %v1074_v23 = vpop.eup %1073 }
 0x26c   :  { %v999_v24 = vmul.f32 %v1074_v23, %v998_v22 }
 0x26e   :  { %v1001_v26 = vadd.f32 %v1000_v25, %v999_v24 }
 0x270   :  { %1002 = vst [vmem:[#allocation10] sm:$0xff] %v1001_v26  ;;  %1004 = vst [vmem:[#allocation11 + $0x8] sm:$0xff] %v1001_v26 }
 0x271   :  { %1166 = shalt.err (!%p1163_p10)
}
 0x272   :  { %1014 = dma.vmem_to_hbm [thread:$0]  %s1012_s3, 128, %s1300_s4, [#allocation4]  }
 0x273   :  { %s1175_s24 = scalar_lea.vmem %s1021_s18, 256  ;;  %p1180_p12 = scmp.lt.s32.totalorder %s1021_s18, %s1021_s18 }
 0x274   :  { %p1176_p11 = scmp.ne.s32.totalorder %s1021_s18, %s1175_s24  ;;  %p1181_p13 = scmp.lt.s32.totalorder %s1175_s24, %s1175_s24 }
 0x276   :  { %p1182_p0 = por %p1181_p13, %p1180_p12 }
 0x278   :  { %p1183_p1 = pnand %p1182_p0, %p1176_p11 }
 0x27a   :  { %1186 = shalt.err (!%p1183_p1)
}
 0x27b   :  { %1026 = dma.vmem_to_hbm [thread:$0]  %s1021_s18, 256, %s1301_s5, [#allocation12], %s1206_s21, %s1206_s21, %s1207_s22  }
 0x27c   :  { %1201 = dma.done.wait [#allocation4], 128  }
 0x27d   :  { %1202 = vsyncadd [#allocation4], 4294967168 }
 0x27e   :  { %1203 = dma.done.wait [#allocation12], 256  }
 0x27f   :  { %1204 = vsyncadd [#allocation12], 4294967040 }
 0x280   :  { %1033 = vsyncpa [#allocation3], 1 }
 0x281   :  { %1034 = vsyncpa [#allocation6], 1 }
 0x282   :  { %1035 = vsyncpa [#allocation9], 1 }
 0x283   :  { %1036 = vsyncpa [#allocation4], 1 }
 0x284   :  { %1037 = vsyncpa [#allocation12], 1 }

</bundles_post_ra>
